<compile_context>
chip_gen: v6e
topology: v6e:2x2x1
jax: 0.10.0
libtpu: 0.0.40
codegen_flags: <defaults>
</compile_context>

<pallas_src>
import jax
import jax.numpy as jnp
from jax.experimental import pallas as pl
from jax.experimental.pallas import tpu as pltpu

_LANES = 512          # lane-dense last dim (multiple of 128)
_MAX_TILE_ROWS = 1024 # (1024, 512) f32 tile = 2 MiB -> 8 MiB live with dbl-buffered in+out


def _rectifier_kernel(lr_ref, x_ref, o_ref):
    # lr_ref: SMEM f32[2] holding (l, r)
    l = lr_ref[0]
    r = lr_ref[1]
    t = l + (r - l) * x_ref[...].astype(jnp.float32)
    # hardtanh(t, 0, 1) == clamp(t, 0, 1); cast back to the output dtype.
    o_ref[...] = jnp.clip(t, 0.0, 1.0).astype(o_ref.dtype)


def rectifier(x, l=-0.1, r=1.1):
    """Pallas implementation of Rectifier.forward. x: any shape, float dtype."""
    orig_shape = x.shape
    orig_dtype = x.dtype
    n = x.size

    # ---- lane-dense tiling plan -------------------------------------------
    rows = pl.cdiv(n, _LANES)
    if rows >= _MAX_TILE_ROWS:
        tm = _MAX_TILE_ROWS
    else:
        tm = max(8, ((rows + 7) // 8) * 8)       # keep (8,128)-aligned tiles
    grid_m = pl.cdiv(rows, tm)
    rows_padded = grid_m * tm
    total_padded = rows_padded * _LANES

    # ---- pad ragged tail so every tile is full and unmasked ---------------
    xf = x.reshape(-1)
    if total_padded != n:
        xf = jnp.pad(xf, (0, total_padded - n))
    x2d = xf.reshape(rows_padded, _LANES)

    lr = jnp.asarray([l, r], dtype=jnp.float32)

    itemsize = jnp.dtype(orig_dtype).itemsize
    out2d = pl.pallas_call(
        _rectifier_kernel,
        out_shape=jax.ShapeDtypeStruct((rows_padded, _LANES), orig_dtype),
        grid_spec=pltpu.PrefetchScalarGridSpec(
            num_scalar_prefetch=0,
            grid=(grid_m,),
            in_specs=[
                pl.BlockSpec(memory_space=pltpu.SMEM),               # (l, r) scalars
                pl.BlockSpec((tm, _LANES), lambda i: (i, 0)),        # input tile
            ],
            out_specs=pl.BlockSpec((tm, _LANES), lambda i: (i, 0)),  # output tile
        ),
        compiler_params=pltpu.CompilerParams(
            dimension_semantics=("parallel",),
        ),
        cost_estimate=pl.CostEstimate(
            flops=3 * total_padded,
            transcendentals=0,
            bytes_accessed=2 * total_padded * itemsize,
        ),
    )(lr, x2d)

    return out2d.reshape(-1)[:n].reshape(orig_shape)


def rectifier_ref(x, l=-0.1, r=1.1):
    t = l + (r - l) * x.astype(jnp.float32)
    return jnp.clip(t, 0.0, 1.0).astype(x.dtype)


if __name__ == "__main__":
    key = jax.random.PRNGKey(0)

    # Small NCHW input consistent with a conv-style module.
    x = jax.random.uniform(key, (2, 4, 16, 16), dtype=jnp.float32,
                           minval=-0.5, maxval=1.5)

    out = jax.block_until_ready(rectifier(x))                 # default l=-0.1, r=1.1
    ref = rectifier_ref(x)
    assert out.shape == x.shape and out.dtype == x.dtype
    assert jnp.allclose(out, ref, atol=1e-6), "mismatch vs reference"

    # Forward-time override of (l, r).
    out2 = jax.block_until_ready(rectifier(x, l=0.0, r=1.0))
    ref2 = rectifier_ref(x, l=0.0, r=1.0)
    assert jnp.allclose(out2, ref2, atol=1e-6), "mismatch vs reference (override)"

    # bf16 input exercises the explicit output-dtype cast path.
    xb = x.astype(jnp.bfloat16)
    outb = jax.block_until_ready(rectifier(xb))
    assert outb.dtype == jnp.bfloat16
    assert jnp.allclose(outb.astype(jnp.float32),
                        rectifier_ref(xb).astype(jnp.float32), atol=1e-2)

    # Larger input exercises the multi-tile pipelined grid (+ ragged tail).
    key2 = jax.random.PRNGKey(1)
    xl = jax.random.uniform(key2, (8, 16, 65, 127), dtype=jnp.float32,
                            minval=-0.5, maxval=1.5)
    outl = jax.block_until_ready(rectifier(xl))
    assert jnp.allclose(outl, rectifier_ref(xl), atol=1e-6), "mismatch (large)"

    print("KERNEL_OK")
</pallas_src>

<mosaic_0001>
module attributes {stable_mosaic.version = 11 : i64} {
  func.func @_rectifier_kernel(%arg0: i32, %arg1: memref<2xf32, #tpu.memory_space<smem>>, %arg2: memref<8x512xf32, #tpu.memory_space<vmem>>, %arg3: memref<8x512xf32, #tpu.memory_space<vmem>>) attributes {dimension_semantics = [#tpu.dimension_semantics<parallel>], iteration_bounds = array<i64: 1>, scalar_prefetch = 0 : i64, scratch_operands = 0 : i64, tpu.core_type = #tpu.core_type<tc>, window_params = [{transform_indices = @transform_0, window_bounds = array<i64: 2>}, {transform_indices = @transform_1, window_bounds = array<i64: 8, 512>}, {transform_indices = @transform_2, window_bounds = array<i64: 8, 512>}]} {
    %c0 = arith.constant 0 : index
    %0 = memref.load %arg1[%c0] : memref<2xf32, #tpu.memory_space<smem>>
    %c1 = arith.constant 1 : index
    %1 = memref.load %arg1[%c1] : memref<2xf32, #tpu.memory_space<smem>>
    %2 = arith.subf %1, %0 : f32
    %c0_0 = arith.constant 0 : index
    %c0_1 = arith.constant 0 : index
    %3 = vector.load %arg2[%c0_0, %c0_1] : memref<8x512xf32, #tpu.memory_space<vmem>>, vector<8x512xf32>
    %4 = vector.broadcast %2 : f32 to vector<8x512xf32>
    %5 = arith.mulf %4, %3 : vector<8x512xf32>
    %6 = vector.broadcast %0 : f32 to vector<8x512xf32>
    %7 = arith.addf %6, %5 : vector<8x512xf32>
    %cst = arith.constant 0.000000e+00 : f32
    %cst_2 = arith.constant 1.000000e+00 : f32
    %8 = vector.broadcast %cst : f32 to vector<8x512xf32>
    %9 = arith.maximumf %8, %7 : vector<8x512xf32>
    %10 = vector.broadcast %cst_2 : f32 to vector<8x512xf32>
    %11 = arith.minimumf %10, %9 : vector<8x512xf32>
    %c0_3 = arith.constant 0 : index
    %c0_4 = arith.constant 0 : index
    %12 = vector.load %arg3[%c0_3, %c0_4] : memref<8x512xf32, #tpu.memory_space<vmem>>, vector<8x512xf32>
    tpu.vector_store %arg3[%c0_3, %c0_4], %11 {strides = array<i32>} : memref<8x512xf32, #tpu.memory_space<vmem>>, vector<8x512xf32>,
    return
  }
  func.func @transform_0(%arg0: i32) -> i32 {
    %c0_i32 = arith.constant 0 : i32
    %c0_i32_0 = arith.constant 0 : i32
    return %c0_i32 : i32
  }
  func.func @transform_1(%arg0: i32) -> (i32, i32) {
    %c0_i32 = arith.constant 0 : i32
    %c0_i32_0 = arith.constant 0 : i32
    return %arg0, %c0_i32 : i32, i32
  }
  func.func @transform_2(%arg0: i32) -> (i32, i32) {
    %c0_i32 = arith.constant 0 : i32
    %c0_i32_0 = arith.constant 0 : i32
    return %arg0, %c0_i32 : i32, i32
  }
}

</mosaic_0001>

<bundles_post_ra>
// kernel: tpu_custom_call.1
= control target key start
LH: loop header
LB: loop body
LE: loop exit
PB: predicated region body
PF: predicated region fallthrough
CT: control target
= control target key end

     0   :  { %7 = vsyncpa [#allocation5], 0  ;;  %s165_s0 = inlined_call_operand.hbm [shape: f32[2], index: 0, kind: input, shape index: {}]   ;;  %s166_s1 = inlined_call_operand.hbm [shape: f32[8,512], index: 1, kind: input, shape index: {}]   ;;  %s167_s2 = inlined_call_operand.hbm [shape: f32[8,512], index: 2, kind: output, shape index: {}]  }
   0x1   :  { %8 = vsyncpa [#allocation3], 0 }
   0x2   :  { %9 = vsyncpa [#allocation4], 0  ;;  %s138_s9 = smov [#allocation2]   ;;  %s139_s12 = smov [#allocation6]  }
   0x3   :  { %17 = dma.hbm_to_smem %s165_s0, 16, %s138_s9, [#allocation5]  }
   0x4   :  { %s24_s13 = sshll.u32 %s139_s12, 4  ;;  %s25_s13 = int_to_ptr.vmem [resolvable:$true] %s24_s13 }
   0x5   :  { %s100_s14 = scalar_lea.vmem %s25_s13, 512  ;;  %p105_p1 = scmp.lt.s32.totalorder %s25_s13, %s25_s13 }
   0x6   :  { %p101_p0 = scmp.ne.s32.totalorder %s25_s13, %s100_s14  ;;  %p106_p2 = scmp.lt.s32.totalorder %s100_s14, %s100_s14 }
   0x8   :  { %p107_p3 = por %p106_p2, %p105_p1 }
   0xa   :  { %p108_p4 = pnand %p107_p3, %p101_p0 }
   0xc   :  { %111 = shalt.err (!%p108_p4)
}
   0xd   :  { %27 = dma.hbm_to_vmem [thread:$0]  %s166_s1, 512, %s25_s13, [#allocation3]  }
   0xe   :  { %132 = dma.done.wait [#allocation5], 16  }
   0xf   :  { %133 = vsyncadd [#allocation5], 4294967280 }
  0x10   :  { %134 = dma.done.wait [#allocation3], 512  }
  0x11   :  { %135 = vsyncadd [#allocation3], 4294966784 }
  0x12   :  { %34 = sfence }
  0x13   :  { %s35_s0 = sld [smem:[#allocation2]]  ;;  %v38_v0 = vld [vmem:[#allocation6] sm:$0xff]  ;;  %v39_v1 = vld [vmem:[#allocation6 + $0x8] sm:$0xff]  ;;  %v40_v2 = vld [vmem:[#allocation6 + $0x10] sm:$0xff]  ;;  %s140_s1 = smov [#allocation7]  }
  0x14   :  { %s80_s17 = sld [smem:[#allocation2 + $0x1]]  ;;  %v41_v3 = vld [vmem:[#allocation6 + $0x18] sm:$0xff]  ;;  %s70_s19 = sshll.u32 %s140_s1, 4  ;;  %s71_s19 = int_to_ptr.vmem [resolvable:$true] %s70_s19 }
  0x15   :  { %s112_s20 = scalar_lea.vmem %s71_s19, 512  ;;  %p117_p6 = scmp.lt.s32.totalorder %s71_s19, %s71_s19 }
  0x16   :  { %p113_p5 = scmp.ne.s32.totalorder %s71_s19, %s112_s20  ;;  %p118_p7 = scmp.lt.s32.totalorder %s112_s20, %s112_s20 }
  0x18   :  { %p119_p8 = por %p118_p7, %p117_p6 }
  0x19   :  { %v47_v5 = vstv %s35_s0 }
  0x1a   :  { %s37_s18 = ssub.f32 %s80_s17, %s35_s0  ;;  %p120_p9 = pnand %p119_p8, %p113_p5 }
  0x1c   :  { %v42_v4 = vstv %s37_s18 }
  0x1d   :  { %v43_v6 = vmul.f32 %v42_v4, %v38_v0  ;;  %v44_v7 = vmul.f32 %v42_v4, %v39_v1  ;;  %v45_v8 = vmul.f32 %v42_v4, %v40_v2  ;;  %v46_v9 = vmul.f32 %v42_v4, %v41_v3 }
  0x1f   :  { %v48_v10 = vadd.f32 %v47_v5, %v43_v6  ;;  %v49_v11 = vadd.f32 %v47_v5, %v44_v7  ;;  %v50_v12 = vadd.f32 %v47_v5, %v45_v8  ;;  %v51_v13 = vadd.f32 %v47_v5, %v46_v9 }
  0x21   :  { %v52_v14 = vmax.f32 %v48_v10, 0.0  ;;  %v53_v15 = vmax.f32 %v49_v11, 0.0  ;;  %v54_v16 = vmax.f32 %v50_v12, 0.0  ;;  %v55_v17 = vmax.f32 %v51_v13, 0.0 }
  0x23   :  { %v56_v18 = vmin.f32 %v52_v14, 1.0  ;;  %v57_v19 = vmin.f32 %v53_v15, 1.0  ;;  %v58_v20 = vmin.f32 %v54_v16, 1.0  ;;  %v59_v21 = vmin.f32 %v55_v17, 1.0 }
  0x25   :  { %60 = vst [vmem:[#allocation7] sm:$0xff] %v56_v18  ;;  %61 = vst [vmem:[#allocation7 + $0x8] sm:$0xff] %v57_v19 }
  0x26   :  { %62 = vst [vmem:[#allocation7 + $0x10] sm:$0xff] %v58_v20  ;;  %63 = vst [vmem:[#allocation7 + $0x18] sm:$0xff] %v59_v21 }
  0x27   :  { %123 = shalt.err (!%p120_p9)
}
  0x28   :  { %73 = dma.vmem_to_hbm [thread:$0]  %s71_s19, 512, %s167_s2, [#allocation4]  }
  0x29   :  { %136 = dma.done.wait [#allocation4], 512  }
  0x2a   :  { %137 = vsyncadd [#allocation4], 4294966784 }
  0x2b   :  { %77 = vsyncpa [#allocation3], 1 }
  0x2c   :  { %78 = vsyncpa [#allocation4], 1 }
  0x2d   :  { %79 = vsyncpa [#allocation5], 1 }

</bundles_post_ra>
